<compile_context>
chip_gen: v5e
topology: v5e:2x2
jax: 0.10.0
libtpu: 0.0.40
codegen_flags: <defaults>
</compile_context>

<pallas_src>
import jax
import jax.numpy as jnp
from jax import lax
from jax.experimental import pallas as pl
from jax.experimental.pallas import tpu as pltpu


def causal_conv1d_kernel(x_ref, halo_ref, w0_ref, w1_ref, b_ref, o_ref):
    # x_ref:    (tile_n, C_in, tile_t)   -- T on lanes
    # halo_ref: (tile_n, C_in, num_t)    -- halo[:, :, j] = x[:, :, j*tile_t - 1]
    # w0/w1:    (C_out, C_in)            -- taps at t-1 / t
    # b:        (C_out, 1)
    # o_ref:    (tile_n, C_out, tile_t)
    t_idx = pl.program_id(1)
    tile_n, _, tile_t = x_ref.shape
    num_t = halo_ref.shape[2]

    w0 = w0_ref[...]
    w1 = w1_ref[...]
    b = b_ref[...]
    lane = lax.broadcasted_iota(jnp.int32, (1, tile_t), 1)
    hcol = lax.broadcasted_iota(jnp.int32, (1, num_t), 1)

    for i in range(tile_n):                        # static unroll over batch rows
        x = x_ref[i]                               # (C_in, tile_t)
        halo = halo_ref[i]                         # (C_in, num_t)

        # Column preceding this tile (column 0 of the halo array is the causal
        # zero pad, so no special-casing of the first tile is needed).
        prev = jnp.sum(jnp.where(hcol == t_idx, halo, jnp.zeros_like(halo)),
                       axis=1, keepdims=True)      # (C_in, 1)

        # Causal shift along lanes: x_prev[:, t] = x[:, t-1]; column 0 <- halo.
        x_roll = pltpu.roll(x, shift=1, axis=1)    # XLU lane rotate (cheap)
        x_prev = jnp.where(lane == 0, prev, x_roll)

        # Two-tap causal conv == two small MXU matmuls, f32 accumulate,
        # lane-dense output; bias broadcasts along lanes.
        acc = jnp.dot(w0, x_prev, preferred_element_type=jnp.float32)
        acc = acc + jnp.dot(w1, x, preferred_element_type=jnp.float32)
        acc = acc + b
        # TODO(synk): WaveNet's gated tanh/sigmoid (and the residual add) could be
        # fused here on the idle EUP/VPU slots to save a full HBM round trip.
        o_ref[i] = acc.astype(o_ref.dtype)


def causal_conv1d(x, weight, bias, *, tile_t_max=32768, vmem_budget_bytes=8 << 20):
    """x: (N, C_in, T), weight: (C_out, C_in, 2), bias: (C_out,). Returns (N, C_out, T)."""
    N, C_in, T = x.shape
    C_out = weight.shape[0]
    itemsize = jnp.dtype(x.dtype).itemsize

    w0 = weight[:, :, 0]                           # tap at t-1
    w1 = weight[:, :, 1]                           # tap at t
    b = bias.reshape(C_out, 1)

    # ---- tile selection: maximize bytes per grid step under the VMEM budget ----
    # Double-buffered (input + output) bytes per (batch row, time sample).
    bytes_per_nt = 2 * (C_in + C_out) * itemsize
    if T <= tile_t_max and T * bytes_per_nt <= vmem_budget_bytes:
        tile_t = T                                 # whole T in one lane-dense block
    else:
        cap = min(tile_t_max, vmem_budget_bytes // bytes_per_nt)
        tile_t = max(128, (cap // 128) * 128)      # big, 128-aligned time tile
    num_t = pl.cdiv(T, tile_t)
    # Pack as many batch rows per step as still fit the budget.
    tile_n = int(max(1, min(N, vmem_budget_bytes // (tile_t * bytes_per_nt))))
    num_n = pl.cdiv(N, tile_n)

    # ---- causal halo: halo[:, :, j] = x[:, :, j*tile_t - 1]; column 0 = zeros ----
    zero_col = jnp.zeros((N, C_in, 1), x.dtype)
    if num_t > 1:
        prev_cols = x[:, :, tile_t - 1:(num_t - 1) * tile_t:tile_t]  # (N, C_in, num_t-1)
        halo = jnp.concatenate([zero_col, prev_cols], axis=2)        # (N, C_in, num_t)
    else:
        halo = zero_col                                              # (N, C_in, 1)

    return pl.pallas_call(
        causal_conv1d_kernel,
        out_shape=jax.ShapeDtypeStruct((N, C_out, T), x.dtype),
        grid_spec=pltpu.PrefetchScalarGridSpec(
            num_scalar_prefetch=0,
            grid=(num_n, num_t),
            in_specs=[
                pl.BlockSpec((tile_n, C_in, tile_t), lambda n, t: (n, 0, t)),
                pl.BlockSpec((tile_n, C_in, num_t), lambda n, t: (n, 0, 0)),
                pl.BlockSpec((C_out, C_in), lambda n, t: (0, 0)),
                pl.BlockSpec((C_out, C_in), lambda n, t: (0, 0)),
                pl.BlockSpec((C_out, 1), lambda n, t: (0, 0)),
            ],
            out_specs=pl.BlockSpec((tile_n, C_out, tile_t), lambda n, t: (n, 0, t)),
        ),
        compiler_params=pltpu.CompilerParams(
            # No cross-step state (halo replaced the carry), so both axes are
            # independent: megacore (v7x, 2 TCs) may shard batch *and* time tiles.
            dimension_semantics=("parallel", "parallel")),
    )(x, halo, w0, w1, b)


def causal_conv1d_ref(x, weight, bias):
    """Pure-JAX reference mirroring the PyTorch forward."""
    x_pad = jnp.pad(x, ((0, 0), (0, 0), (1, 0)))
    y = lax.conv_general_dilated(
        x_pad, weight, window_strides=(1,), padding="VALID",
        dimension_numbers=("NCH", "OIH", "NCH"))
    return y + bias.reshape(1, -1, 1)


if __name__ == "__main__":
    key = jax.random.PRNGKey(0)
    kx, kw, kb, kx2, kx3 = jax.random.split(key, 5)

    # Small shapes implied by the module: batch=2, input_dim=4, output_dim=8, T=16.
    N, C_in, C_out, T = 2, 4, 8, 16
    x = jax.random.normal(kx, (N, C_in, T), dtype=jnp.float32)
    weight = jax.random.normal(kw, (C_out, C_in, 2), dtype=jnp.float32) * 0.1
    bias = jax.random.normal(kb, (C_out,), dtype=jnp.float32) * 0.1

    y = jax.block_until_ready(causal_conv1d(x, weight, bias))
    y_ref = jax.block_until_ready(causal_conv1d_ref(x, weight, bias))
    assert y.shape == (N, C_out, T), y.shape
    assert jnp.allclose(y, y_ref, atol=1e-5, rtol=1e-5), "mismatch (small T, single tile)"

    # Exercise the T-tiling + cross-tile halo path (tile cap forced small for the test).
    T2 = 1024
    x2 = jax.random.normal(kx2, (N, C_in, T2), dtype=jnp.float32)
    y2 = jax.block_until_ready(causal_conv1d(x2, weight, bias, tile_t_max=256))
    y2_ref = jax.block_until_ready(causal_conv1d_ref(x2, weight, bias))
    assert y2.shape == (N, C_out, T2), y2.shape
    assert jnp.allclose(y2, y2_ref, atol=1e-5, rtol=1e-5), "mismatch (tiled T)"

    # Ragged last time tile (partial-block store path).
    T3 = 1000
    x3 = jax.random.normal(kx3, (N, C_in, T3), dtype=jnp.float32)
    y3 = jax.block_until_ready(causal_conv1d(x3, weight, bias, tile_t_max=256))
    y3_ref = jax.block_until_ready(causal_conv1d_ref(x3, weight, bias))
    assert y3.shape == (N, C_out, T3), y3.shape
    assert jnp.allclose(y3, y3_ref, atol=1e-5, rtol=1e-5), "mismatch (ragged last tile)"

    print("KERNEL_OK")
</pallas_src>

<mosaic_0001>
module attributes {stable_mosaic.version = 11 : i64} {
  func.func @causal_conv1d_kernel(%arg0: i32, %arg1: i32, %arg2: memref<2x4x16xf32, #tpu.memory_space<vmem>>, %arg3: memref<2x4x1xf32, #tpu.memory_space<vmem>>, %arg4: memref<8x4xf32, #tpu.memory_space<vmem>>, %arg5: memref<8x4xf32, #tpu.memory_space<vmem>>, %arg6: memref<8x1xf32, #tpu.memory_space<vmem>>, %arg7: memref<2x8x16xf32, #tpu.memory_space<vmem>>) attributes {dimension_semantics = [#tpu.dimension_semantics<parallel>, #tpu.dimension_semantics<parallel>], iteration_bounds = array<i64: 1, 1>, scalar_prefetch = 0 : i64, scratch_operands = 0 : i64, tpu.core_type = #tpu.core_type<tc>, window_params = [{transform_indices = @transform_0, window_bounds = array<i64: 2, 4, 16>}, {transform_indices = @transform_1, window_bounds = array<i64: 2, 4, 1>}, {pipeline_mode = #tpu.pipeline_mode<synchronous>, transform_indices = @transform_2, window_bounds = array<i64: 8, 4>}, {pipeline_mode = #tpu.pipeline_mode<synchronous>, transform_indices = @transform_3, window_bounds = array<i64: 8, 4>}, {pipeline_mode = #tpu.pipeline_mode<synchronous>, transform_indices = @transform_4, window_bounds = array<i64: 8, 1>}, {transform_indices = @transform_5, window_bounds = array<i64: 2, 8, 16>}]} {
    %c0 = arith.constant 0 : index
    %c0_0 = arith.constant 0 : index
    %0 = vector.load %arg4[%c0, %c0_0] : memref<8x4xf32, #tpu.memory_space<vmem>>, vector<8x4xf32>
    %c0_1 = arith.constant 0 : index
    %c0_2 = arith.constant 0 : index
    %1 = vector.load %arg5[%c0_1, %c0_2] : memref<8x4xf32, #tpu.memory_space<vmem>>, vector<8x4xf32>
    %c0_3 = arith.constant 0 : index
    %c0_4 = arith.constant 0 : index
    %2 = vector.load %arg6[%c0_3, %c0_4] : memref<8x1xf32, #tpu.memory_space<vmem>>, vector<8x1xf32>
    %3 = tpu.iota {dimensions = array<i32: 1>} : vector<1x16xi32>
    %4 = tpu.iota {dimensions = array<i32: 1>} : vector<1x1xi32>
    %c0_5 = arith.constant 0 : index
    %c0_6 = arith.constant 0 : index
    %c0_7 = arith.constant 0 : index
    %5 = vector.load %arg2[%c0_5, %c0_6, %c0_7] : memref<2x4x16xf32, #tpu.memory_space<vmem>>, vector<1x4x16xf32>
    %6 = vector.shape_cast %5 : vector<1x4x16xf32> to vector<4x16xf32>
    %c0_8 = arith.constant 0 : index
    %c0_9 = arith.constant 0 : index
    %c0_10 = arith.constant 0 : index
    %7 = vector.load %arg3[%c0_8, %c0_9, %c0_10] : memref<2x4x1xf32, #tpu.memory_space<vmem>>, vector<1x4x1xf32>
    %8 = vector.shape_cast %7 : vector<1x4x1xf32> to vector<4x1xf32>
    %9 = vector.broadcast %arg1 : i32 to vector<1x1xi32>
    %10 = arith.cmpi eq, %4, %9 : vector<1x1xi32>
    %cst = arith.constant 0.000000e+00 : f32
    %11 = vector.broadcast %cst : f32 to vector<4x1xf32>
    %12 = vector.shape_cast %10 : vector<1x1xi1> to vector<1x1xi1>
    %13 = vector.broadcast %12 : vector<1x1xi1> to vector<4x1xi1>
    %14 = arith.select %13, %8, %11 : vector<4x1xi1>, vector<4x1xf32>
    %cst_11 = arith.constant dense<0.000000e+00> : vector<4xf32>
    %15 = vector.multi_reduction <add>, %14, %cst_11 [1] : vector<4x1xf32> to vector<4xf32>
    %16 = vector.shape_cast %15 : vector<4xf32> to vector<4x1xf32>
    %c1_i32 = arith.constant 1 : i32
    %17 = tpu.dynamic_rotate %6 by %c1_i32 dim 1 : vector<4x16xf32>, i32 -> vector<4x16xf32>
    %c0_i32 = arith.constant 0 : i32
    %18 = vector.broadcast %c0_i32 : i32 to vector<1x16xi32>
    %19 = arith.cmpi eq, %3, %18 : vector<1x16xi32>
    %20 = vector.shape_cast %19 : vector<1x16xi1> to vector<1x16xi1>
    %21 = vector.broadcast %20 : vector<1x16xi1> to vector<4x16xi1>
    %22 = vector.shape_cast %16 : vector<4x1xf32> to vector<4x1xf32>
    %23 = vector.broadcast %22 : vector<4x1xf32> to vector<4x16xf32>
    %24 = arith.select %21, %23, %17 : vector<4x16xi1>, vector<4x16xf32>
    %cst_12 = arith.constant dense<0.000000e+00> : vector<8x16xf32>
    %25 = tpu.matmul %0, %24, %cst_12 {dimension_numbers = #tpu.dot_dimension_numbers<[1], [0], [0], [1], [0, 0, 1, 1], [], []>} : vector<8x4xf32>, vector<4x16xf32>, vector<8x16xf32> -> vector<8x16xf32>
    %cst_13 = arith.constant dense<0.000000e+00> : vector<8x16xf32>
    %26 = tpu.matmul %1, %6, %cst_13 {dimension_numbers = #tpu.dot_dimension_numbers<[1], [0], [0], [1], [0, 0, 1, 1], [], []>} : vector<8x4xf32>, vector<4x16xf32>, vector<8x16xf32> -> vector<8x16xf32>
    %27 = arith.addf %25, %26 : vector<8x16xf32>
    %28 = vector.broadcast %2 : vector<8x1xf32> to vector<8x16xf32>
    %29 = arith.addf %27, %28 : vector<8x16xf32>
    %c0_14 = arith.constant 0 : index
    %c0_15 = arith.constant 0 : index
    %c0_16 = arith.constant 0 : index
    %30 = vector.load %arg7[%c0_14, %c0_15, %c0_16] : memref<2x8x16xf32, #tpu.memory_space<vmem>>, vector<1x8x16xf32>
    %31 = vector.shape_cast %30 : vector<1x8x16xf32> to vector<8x16xf32>
    %32 = vector.shape_cast %29 : vector<8x16xf32> to vector<1x8x16xf32>
    tpu.vector_store %arg7[%c0_14, %c0_15, %c0_16], %32 {strides = array<i32>} : memref<2x8x16xf32, #tpu.memory_space<vmem>>, vector<1x8x16xf32>,
    %c1 = arith.constant 1 : index
    %c0_17 = arith.constant 0 : index
    %c0_18 = arith.constant 0 : index
    %33 = vector.load %arg2[%c1, %c0_17, %c0_18] : memref<2x4x16xf32, #tpu.memory_space<vmem>>, vector<1x4x16xf32>
    %34 = vector.shape_cast %33 : vector<1x4x16xf32> to vector<4x16xf32>
    %c1_19 = arith.constant 1 : index
    %c0_20 = arith.constant 0 : index
    %c0_21 = arith.constant 0 : index
    %35 = vector.load %arg3[%c1_19, %c0_20, %c0_21] : memref<2x4x1xf32, #tpu.memory_space<vmem>>, vector<1x4x1xf32>
    %36 = vector.shape_cast %35 : vector<1x4x1xf32> to vector<4x1xf32>
    %37 = vector.broadcast %arg1 : i32 to vector<1x1xi32>
    %38 = arith.cmpi eq, %4, %37 : vector<1x1xi32>
    %cst_22 = arith.constant 0.000000e+00 : f32
    %39 = vector.broadcast %cst_22 : f32 to vector<4x1xf32>
    %40 = vector.shape_cast %38 : vector<1x1xi1> to vector<1x1xi1>
    %41 = vector.broadcast %40 : vector<1x1xi1> to vector<4x1xi1>
    %42 = arith.select %41, %36, %39 : vector<4x1xi1>, vector<4x1xf32>
    %cst_23 = arith.constant dense<0.000000e+00> : vector<4xf32>
    %43 = vector.multi_reduction <add>, %42, %cst_23 [1] : vector<4x1xf32> to vector<4xf32>
    %44 = vector.shape_cast %43 : vector<4xf32> to vector<4x1xf32>
    %c1_i32_24 = arith.constant 1 : i32
    %45 = tpu.dynamic_rotate %34 by %c1_i32_24 dim 1 : vector<4x16xf32>, i32 -> vector<4x16xf32>
    %c0_i32_25 = arith.constant 0 : i32
    %46 = vector.broadcast %c0_i32_25 : i32 to vector<1x16xi32>
    %47 = arith.cmpi eq, %3, %46 : vector<1x16xi32>
    %48 = vector.shape_cast %47 : vector<1x16xi1> to vector<1x16xi1>
    %49 = vector.broadcast %48 : vector<1x16xi1> to vector<4x16xi1>
    %50 = vector.shape_cast %44 : vector<4x1xf32> to vector<4x1xf32>
    %51 = vector.broadcast %50 : vector<4x1xf32> to vector<4x16xf32>
    %52 = arith.select %49, %51, %45 : vector<4x16xi1>, vector<4x16xf32>
    %cst_26 = arith.constant dense<0.000000e+00> : vector<8x16xf32>
    %53 = tpu.matmul %0, %52, %cst_26 {dimension_numbers = #tpu.dot_dimension_numbers<[1], [0], [0], [1], [0, 0, 1, 1], [], []>} : vector<8x4xf32>, vector<4x16xf32>, vector<8x16xf32> -> vector<8x16xf32>
    %cst_27 = arith.constant dense<0.000000e+00> : vector<8x16xf32>
    %54 = tpu.matmul %1, %34, %cst_27 {dimension_numbers = #tpu.dot_dimension_numbers<[1], [0], [0], [1], [0, 0, 1, 1], [], []>} : vector<8x4xf32>, vector<4x16xf32>, vector<8x16xf32> -> vector<8x16xf32>
    %55 = arith.addf %53, %54 : vector<8x16xf32>
    %56 = vector.broadcast %2 : vector<8x1xf32> to vector<8x16xf32>
    %57 = arith.addf %55, %56 : vector<8x16xf32>
    %c1_28 = arith.constant 1 : index
    %c0_29 = arith.constant 0 : index
    %c0_30 = arith.constant 0 : index
    %58 = vector.load %arg7[%c1_28, %c0_29, %c0_30] : memref<2x8x16xf32, #tpu.memory_space<vmem>>, vector<1x8x16xf32>
    %59 = vector.shape_cast %58 : vector<1x8x16xf32> to vector<8x16xf32>
    %60 = vector.shape_cast %57 : vector<8x16xf32> to vector<1x8x16xf32>
    tpu.vector_store %arg7[%c1_28, %c0_29, %c0_30], %60 {strides = array<i32>} : memref<2x8x16xf32, #tpu.memory_space<vmem>>, vector<1x8x16xf32>,
    return
  }
  func.func @transform_0(%arg0: i32, %arg1: i32) -> (i32, i32, i32) {
    %c0_i32 = arith.constant 0 : i32
    %c0_i32_0 = arith.constant 0 : i32
    return %arg0, %c0_i32, %arg1 : i32, i32, i32
  }
  func.func @transform_1(%arg0: i32, %arg1: i32) -> (i32, i32, i32) {
    %c0_i32 = arith.constant 0 : i32
    %c0_i32_0 = arith.constant 0 : i32
    %c0_i32_1 = arith.constant 0 : i32
    return %arg0, %c0_i32, %c0_i32_0 : i32, i32, i32
  }
  func.func @transform_2(%arg0: i32, %arg1: i32) -> (i32, i32) {
    %c0_i32 = arith.constant 0 : i32
    %c0_i32_0 = arith.constant 0 : i32
    %c0_i32_1 = arith.constant 0 : i32
    return %c0_i32, %c0_i32_0 : i32, i32
  }
  func.func @transform_3(%arg0: i32, %arg1: i32) -> (i32, i32) {
    %c0_i32 = arith.constant 0 : i32
    %c0_i32_0 = arith.constant 0 : i32
    %c0_i32_1 = arith.constant 0 : i32
    return %c0_i32, %c0_i32_0 : i32, i32
  }
  func.func @transform_4(%arg0: i32, %arg1: i32) -> (i32, i32) {
    %c0_i32 = arith.constant 0 : i32
    %c0_i32_0 = arith.constant 0 : i32
    %c0_i32_1 = arith.constant 0 : i32
    return %c0_i32, %c0_i32_0 : i32, i32
  }
  func.func @transform_5(%arg0: i32, %arg1: i32) -> (i32, i32, i32) {
    %c0_i32 = arith.constant 0 : i32
    %c0_i32_0 = arith.constant 0 : i32
    return %arg0, %c0_i32, %arg1 : i32, i32, i32
  }
}

</mosaic_0001>

<bundles_post_ra>
// kernel: tpu_custom_call.1
= control target key start
LH: loop header
LB: loop body
LE: loop exit
PB: predicated region body
PF: predicated region fallthrough
CT: control target
= control target key end

     0   :  { %s249_s20 = smov 16   ;;  %s321_s0 = inlined_call_operand.vmem [shape: f32[2,4,16], index: 0, kind: input, shape index: {}]   ;;  %s322_s1 = inlined_call_operand.vmem [shape: f32[2,4,1], index: 1, kind: input, shape index: {}]   ;;  %s323_s2 = inlined_call_operand.vmem [shape: f32[8,4], index: 2, kind: input, shape index: {}]   ;;  %s324_s3 = inlined_call_operand.vmem [shape: f32[8,4], index: 3, kind: input, shape index: {}]   ;;  %s325_s4 = inlined_call_operand.vmem [shape: f32[8,1], index: 4, kind: input, shape index: {}]   ;;  %s326_s5 = inlined_call_operand.hbm [shape: f32[2,8,16], index: 5, kind: output, shape index: {}]  }
   0x1   :  { %v209_v0 = vld [vmem:[%s321_s0 + $0x4] sm:$0xf] }
   0x2   :  { %122 = vrot.lane.b32.xlu0 %v209_v0, %s249_s20 }
   0x3   :  { %10 = vsyncpa [#allocation3], 0  ;;  %v26_v1 = vld [vmem:[%s321_s0] sm:$0xf]  ;;  %v24_v2 = vlaneseq  ;;  %v250_v3 = vmov 0   ;;  %vm34_vm1 = vcmask 1047680  }
   0x4   :  { %221 = vset.pattern.permute.xlu2 %v250_v3  ;;  %222 = vset.pattern.permute.xlu0 %v250_v3  ;;  %v210_v5 = vld [vmem:[%s322_s1 + $0x4] sm:$0xf]  ;;  %v27_v11 = vld [vmem:[%s322_s1] sm:$0xf]  ;;  %s251_s26 = smov 113   ;;  %vm58_vm2 = vcmask 1043456  }
   0x5   :  { %v25_v4 = vand.u32 127, %v24_v2  ;;  %v23_v15 = vld [vmem:[%s325_s4] sm:$0xff]  ;;  %211 = vmatpush.msk.msra.mxu2 %vm58_vm2, %v209_v0  ;;  %205 = vmatpush.msk.msra.mxu0 %vm58_vm2, %v26_v1  ;;  %vm54_vm3 = vcmask 31744   ;;  %vm114_vm4 = vcmask 130048   ;;  %s193_s8 = sshll.u32 %s326_s5, 4  ;;  %s253_s9 = smov 128   ;;  %s194_s8 = int_to_ptr.hbm [resolvable:$true] %s193_s8 }
   0x6   :  { %v22_v18 = vld [vmem:[%s324_s3] sm:$0xff]  ;;  %s254_s10 = smov 8  }
   0x7   :  { %vm29_vm0 = vcmp.eq.s32.totalorder %v25_v4, 0  ;;  %212 = vmatmul.msk.f32.vlgmr.msra.gmra.mxu2 %vm54_vm3, %v22_v18  ;;  %206 = vmatmul.msk.f32.vlgmr.msra.gmra.mxu0 %vm54_vm3, %v22_v18  ;;  %v21_v21 = vld [vmem:[%s323_s2] sm:$0xff]  ;;  %s252_s2 = smov [#allocation2]  }
   0x8   :  { %v120_v6 = vsel %vm29_vm0, %v210_v5, 0.0  ;;  %v32_v12 = vsel %vm29_vm0, %v27_v11, 0.0  ;;  %s191_s3 = sshll.u32 %s252_s2, 4  ;;  %s192_s3 = int_to_ptr.vmem [resolvable:$true] %s191_s3 }
   0x9   :  { %130 = vperm.xlu2 %221, %v120_v6  }
   0xa   :  { %35 = vrot.lane.b32.xlu0 %v26_v1, %s249_s20 }
  0x12   :  { %46 = vperm.xlu0 %222, %v32_v12  }
  0x63   :  { %v131_v19 = vpop.permute.xlu2 %130 }
  0x74   :  { %v123_v7 = vpop.permute.xlu0 %122 }
  0x75   :  { %v124_v8 = vsel %vm34_vm1, %v123_v7, %v209_v0 }
  0x76   :  { %125 = vrot.lane.b32.xlu1 %v124_v8, %s249_s20 }
  0x7c   :  { %v36_v9 = vpop.permute.xlu0 %35 }
  0x7d   :  { %v37_v10 = vsel %vm34_vm1, %v36_v9, %v26_v1 }
  0x7e   :  { %38 = vrot.lane.b32.xlu1 %v37_v10, %s249_s20 }
  0x84   :  { %v47_v23 = vpop.permute.xlu0 %46  ;;  %v79_v31 = vpop.f32.mrf.mxu0 }
  0x8a   :  { %v158_v26 = vpop.f32.mrf.mxu2 }
  0xe8   :  { %v126_v13 = vpop.permute.xlu1 %125 }
  0xe9   :  { %v127_v14 = vsel %vm34_vm1, %v126_v13, %v209_v0 }
  0xea   :  { %134 = vrot.lane.b32.xlu2 %v127_v14, %s251_s26 }
  0xf0   :  { %v39_v16 = vpop.permute.xlu1 %38 }
  0xf1   :  { %v40_v17 = vsel %vm34_vm1, %v39_v16, %v26_v1 }
  0xf2   :  { %50 = vrot.lane.b32.xlu1 %v40_v17, %s251_s26  ;;  %110 = vperm.xlu2 %221, %v23_v15  }
 0x144   :  { %v135_v20 = vpop.permute.xlu2 %134 }
 0x145   :  { %v137_v22 = vsel %vm29_vm0, %v131_v19, %v135_v20 }
 0x146   :  { %213 = vmatpush.msk.msra.mxu3 %vm58_vm2, %v137_v22 }
 0x147   :  { %214 = vmatmul.msk.f32.vlgmr.msra.gmra.mxu3 %vm54_vm3, %v21_v21 }
 0x14c   :  { %v111_v29 = vpop.permute.xlu2 %110 }
 0x164   :  { %v51_v24 = vpop.permute.xlu1 %50 }
 0x165   :  { %v53_v25 = vsel %vm29_vm0, %v47_v23, %v51_v24 }
 0x166   :  { %207 = vmatpush.msk.msra.mxu1 %vm58_vm2, %v53_v25 }
 0x167   :  { %208 = vmatmul.msk.f32.vlgmr.msra.gmra.mxu1 %vm54_vm3, %v21_v21 }
 0x1ca   :  { %v181_v27 = vpop.f32.mrf.mxu3 }
 0x1cb   :  { %v182_v28 = vadd.f32 %v181_v27, %v158_v26 }
 0x1cd   :  { %v184_v30 = vadd.f32 %v182_v28, %v111_v29 }
 0x1cf   :  { %186 = vst.msk [vmem:[#allocation2 + $0x8] sm:$0xff] %vm114_vm4, %v184_v30 }
 0x1e4   :  { %v105_v32 = vpop.f32.mrf.mxu1 }
 0x1e5   :  { %v106_v33 = vadd.f32 %v105_v32, %v79_v31 }
 0x1e7   :  { %v113_v34 = vadd.f32 %v111_v29, %v106_v33 }
 0x1e9   :  { %115 = vst.msk [vmem:[#allocation2] sm:$0xff] %vm114_vm4, %v113_v34 }
 0x1ea   :  { %199 = dma.vmem_to_hbm [thread:$0]  %s192_s3, 256, %s194_s8, [#allocation3], %s253_s9, %s253_s9, %s254_s10  }
 0x1eb   :  { %247 = dma.done.wait [#allocation3], 256  }
 0x1ec   :  { %248 = vsyncadd [#allocation3], 4294967040 }
 0x1ed   :  { %204 = vsyncpa [#allocation3], 1 }

</bundles_post_ra>
